<compile_context>
chip_gen: v5e
topology: v5e:2x2
jax: 0.10.0
libtpu: 0.0.40
codegen_flags: <defaults>
</compile_context>

<pallas_src>
import functools

import jax
import jax.numpy as jnp
from jax.experimental import pallas as pl
from jax.experimental.pallas import tpu as pltpu

LANE = 128           # lane width
SUB = 8              # sublanes per f32 vreg
MAX_TILE_ROWS = 2048 # 2048*128*4B = 1 MiB per f32 input block
NUM_SHARDS = 2       # leading "parallel" grid axis (2 TCs on v7x)


def _focal_tversky_kernel(x_ref, t_ref, out_ref, *, rows, tile_rows,
                          tiles_per_shard, need_mask):
    c = pl.program_id(0)   # shard (parallel)
    j = pl.program_id(1)   # tile within shard (reduction, arbitrary)

    @pl.when(j == 0)
    def _init():
        out_ref[...] = jnp.zeros_like(out_ref)

    # Hot path: cast in-register, sigmoid, single product.
    p = jax.nn.sigmoid(x_ref[...].astype(jnp.float32))
    t = t_ref[...].astype(jnp.float32)

    if need_mask:
        # Rows at/after `rows` are either stale VMEM (partial last block) or a
        # clamped re-read of a valid block; zero them out of the sums.
        base = (c * tiles_per_shard + j) * tile_rows
        row_ids = base + jax.lax.broadcasted_iota(jnp.int32, (tile_rows, 1), 0)
        valid = row_ids < rows
        p = jnp.where(valid, p, 0.0)
        t = jnp.where(valid, t, 0.0)

    pt = p * t

    if tile_rows % SUB == 0:
        # Whole-vreg accumulation: fold the tile down to one (8,128) partial
        # with pure VPU vreg adds; no XLU reduce in the hot loop.
        def red(a):
            return a.reshape(tile_rows // SUB, SUB, LANE).sum(axis=0)
    else:
        # Tiny single-tile fallback (rows < MAX_TILE_ROWS and not a multiple
        # of 8); perf is irrelevant here.
        def red(a):
            return jnp.sum(a, axis=0, keepdims=True)

    pt_part, p_part, t_part = red(pt), red(p), red(t)
    sub = pt_part.shape[0]
    out_ref[0, 0, :sub, :] += pt_part   # TP partials
    out_ref[0, 1, :sub, :] += p_part    # sum(p) partials
    out_ref[0, 2, :sub, :] += t_part    # sum(t) partials


def focal_tversky_loss(inputs, targets, smooth=1.0,
                       alpha_ft=0.5, beta_ft=0.5, gamma_ft=1.0):
    """Pallas implementation of FocalTverskyLoss.forward."""
    x = inputs.reshape(-1)   # keep native dtype; kernel casts to f32
    t = targets.reshape(-1)
    n = x.shape[0]

    # Only pad the flat tail up to a lane multiple (128) when strictly needed
    # for the (rows, 128) reshape.  Padded logits -> sigmoid == 0 and padded
    # targets == 0, so the tail contributes nothing.
    pad = (-n) % LANE
    if pad:
        if jnp.issubdtype(x.dtype, jnp.floating):
            x = jnp.pad(x, (0, pad), constant_values=jnp.finfo(x.dtype).min)
        else:
            x = x.astype(jnp.float32)
            x = jnp.pad(x, (0, pad), constant_values=-1e30)
        t = jnp.pad(t, (0, pad), constant_values=0)

    rows = (n + pad) // LANE
    x2 = x.reshape(rows, LANE)
    t2 = t.reshape(rows, LANE)

    tile_rows = rows if rows <= MAX_TILE_ROWS else MAX_TILE_ROWS
    raw_tiles = pl.cdiv(rows, tile_rows)
    tiles_per_shard = pl.cdiv(raw_tiles, NUM_SHARDS)
    # Mask needed if the (shards x tiles x tile_rows) cover exceeds real rows.
    need_mask = (NUM_SHARDS * tiles_per_shard * tile_rows != rows)

    def in_map(c, j):
        blk = c * tiles_per_shard + j
        # Clamp so no DMA ever targets a block past the array; the row mask
        # zeroes any duplicated / out-of-range contribution.
        blk = jnp.minimum(blk, raw_tiles - 1)
        return (blk, 0)

    kernel = functools.partial(
        _focal_tversky_kernel,
        rows=rows, tile_rows=tile_rows,
        tiles_per_shard=tiles_per_shard, need_mask=need_mask)

    partials = pl.pallas_call(
        kernel,
        out_shape=jax.ShapeDtypeStruct((NUM_SHARDS, 3, SUB, LANE), jnp.float32),
        grid_spec=pltpu.PrefetchScalarGridSpec(
            num_scalar_prefetch=0,
            grid=(NUM_SHARDS, tiles_per_shard),
            in_specs=[
                pl.BlockSpec((tile_rows, LANE), in_map),
                pl.BlockSpec((tile_rows, LANE), in_map),
            ],
            # Per-shard resident accumulator block (constant in j).
            out_specs=pl.BlockSpec((1, 3, SUB, LANE),
                                   lambda c, j: (c, 0, 0, 0)),
        ),
        compiler_params=pltpu.CompilerParams(
            dimension_semantics=("parallel", "arbitrary"),
            vmem_limit_bytes=32 * 1024 * 1024),
    )(x2, t2)

    # Tiny final combine (2*3*8*128 floats) in plain JAX.
    sums = jnp.sum(partials, axis=(0, 2, 3))          # (3,)
    tp, sum_p, sum_t = sums[0], sums[1], sums[2]
    fp = sum_p - tp
    fn = sum_t - tp
    tversky = (tp + smooth) / (tp + alpha_ft * fp + beta_ft * fn + smooth)
    return (1.0 - tversky) ** gamma_ft


def focal_tversky_loss_ref(inputs, targets, smooth=1.0,
                           alpha_ft=0.5, beta_ft=0.5, gamma_ft=1.0):
    """Pure-JAX reference mirroring the PyTorch module."""
    p = jax.nn.sigmoid(inputs.astype(jnp.float32)).reshape(-1)
    t = targets.astype(jnp.float32).reshape(-1)
    tp = jnp.sum(p * t)
    fp = jnp.sum((1.0 - t) * p)
    fn = jnp.sum(t * (1.0 - p))
    tversky = (tp + smooth) / (tp + alpha_ft * fp + beta_ft * fn + smooth)
    return (1.0 - tversky) ** gamma_ft


if __name__ == "__main__":
    key = jax.random.PRNGKey(0)
    k1, k2 = jax.random.split(key)

    # Small shapes consistent with a segmentation logits/targets pair (NCHW).
    inputs = jax.random.normal(k1, (2, 4, 16, 16), dtype=jnp.float32)
    targets = (jax.random.uniform(k2, (2, 4, 16, 16)) > 0.5).astype(jnp.float32)

    loss = jax.block_until_ready(focal_tversky_loss(inputs, targets, smooth=1.0))
    ref = jax.block_until_ready(focal_tversky_loss_ref(inputs, targets, smooth=1.0))

    assert jnp.allclose(loss, ref, atol=1e-5, rtol=1e-5), (loss, ref)
    print("KERNEL_OK")
</pallas_src>

<mosaic_0001>
module attributes {stable_mosaic.version = 11 : i64} {
  func.func @_focal_tversky_kernel(%arg0: i32, %arg1: i32, %arg2: memref<16x128xf32, #tpu.memory_space<vmem>>, %arg3: memref<16x128xf32, #tpu.memory_space<vmem>>, %arg4: memref<1x3x8x128xf32, #tpu.memory_space<vmem>>) attributes {dimension_semantics = [#tpu.dimension_semantics<parallel>, #tpu.dimension_semantics<arbitrary>], iteration_bounds = array<i64: 2, 1>, scalar_prefetch = 0 : i64, scratch_operands = 0 : i64, tpu.core_type = #tpu.core_type<tc>, window_params = [{transform_indices = @transform_0, window_bounds = array<i64: 16, 128>}, {transform_indices = @transform_1, window_bounds = array<i64: 16, 128>}, {transform_indices = @transform_2, window_bounds = array<i64: 1, 3, 8, 128>}]} {
    %c0_i32 = arith.constant 0 : i32
    %0 = arith.cmpi eq, %arg1, %c0_i32 : i32
    %1 = arith.extui %0 : i1 to i32
    %c0_i32_0 = arith.constant 0 : i32
    %2 = arith.cmpi ne, %1, %c0_i32_0 : i32
    scf.if %2 {
      %cst_32 = arith.constant 0.000000e+00 : f32
      %51 = vector.broadcast %cst_32 : f32 to vector<1x3x8x128xf32>
      %c0_33 = arith.constant 0 : index
      %c0_34 = arith.constant 0 : index
      %c0_35 = arith.constant 0 : index
      %c0_36 = arith.constant 0 : index
      %52 = vector.load %arg4[%c0_33, %c0_34, %c0_35, %c0_36] : memref<1x3x8x128xf32, #tpu.memory_space<vmem>>, vector<1x3x8x128xf32>
      tpu.vector_store %arg4[%c0_33, %c0_34, %c0_35, %c0_36], %51 {strides = array<i32>} : memref<1x3x8x128xf32, #tpu.memory_space<vmem>>, vector<1x3x8x128xf32>,
    } else {
    }
    %c0 = arith.constant 0 : index
    %c0_1 = arith.constant 0 : index
    %3 = vector.load %arg2[%c0, %c0_1] : memref<16x128xf32, #tpu.memory_space<vmem>>, vector<16x128xf32>
    %4 = arith.negf %3 : vector<16x128xf32>
    %5 = math.exp %4 : vector<16x128xf32>
    %cst = arith.constant 1.000000e+00 : f32
    %6 = vector.broadcast %cst : f32 to vector<16x128xf32>
    %7 = arith.addf %6, %5 : vector<16x128xf32>
    %8 = arith.divf %6, %7 : vector<16x128xf32>
    %c0_2 = arith.constant 0 : index
    %c0_3 = arith.constant 0 : index
    %9 = vector.load %arg3[%c0_2, %c0_3] : memref<16x128xf32, #tpu.memory_space<vmem>>, vector<16x128xf32>
    %c1_i32 = arith.constant 1 : i32
    %10 = arith.muli %arg0, %c1_i32 : i32
    %11 = arith.addi %10, %arg1 : i32
    %c16_i32 = arith.constant 16 : i32
    %12 = arith.muli %11, %c16_i32 : i32
    %13 = tpu.iota {dimensions = array<i32: 0>} : vector<16x1xi32>
    %14 = vector.broadcast %12 : i32 to vector<16x1xi32>
    %15 = arith.addi %14, %13 : vector<16x1xi32>
    %c16_i32_4 = arith.constant 16 : i32
    %16 = vector.broadcast %c16_i32_4 : i32 to vector<16x1xi32>
    %17 = arith.cmpi slt, %15, %16 : vector<16x1xi32>
    %cst_5 = arith.constant 0.000000e+00 : f32
    %18 = vector.shape_cast %17 : vector<16x1xi1> to vector<16x1xi1>
    %19 = vector.broadcast %18 : vector<16x1xi1> to vector<16x128xi1>
    %20 = vector.broadcast %cst_5 : f32 to vector<16x128xf32>
    %21 = arith.select %19, %8, %20 : vector<16x128xi1>, vector<16x128xf32>
    %cst_6 = arith.constant 0.000000e+00 : f32
    %22 = vector.shape_cast %17 : vector<16x1xi1> to vector<16x1xi1>
    %23 = vector.broadcast %22 : vector<16x1xi1> to vector<16x128xi1>
    %24 = vector.broadcast %cst_6 : f32 to vector<16x128xf32>
    %25 = arith.select %23, %9, %24 : vector<16x128xi1>, vector<16x128xf32>
    %26 = arith.mulf %21, %25 : vector<16x128xf32>
    %27 = vector.shape_cast %26 : vector<16x128xf32> to vector<2x8x128xf32>
    %cst_7 = arith.constant dense<0.000000e+00> : vector<8x128xf32>
    %28 = vector.multi_reduction <add>, %27, %cst_7 [0] : vector<2x8x128xf32> to vector<8x128xf32>
    %29 = vector.shape_cast %21 : vector<16x128xf32> to vector<2x8x128xf32>
    %cst_8 = arith.constant dense<0.000000e+00> : vector<8x128xf32>
    %30 = vector.multi_reduction <add>, %29, %cst_8 [0] : vector<2x8x128xf32> to vector<8x128xf32>
    %31 = vector.shape_cast %25 : vector<16x128xf32> to vector<2x8x128xf32>
    %cst_9 = arith.constant dense<0.000000e+00> : vector<8x128xf32>
    %32 = vector.multi_reduction <add>, %31, %cst_9 [0] : vector<2x8x128xf32> to vector<8x128xf32>
    %c0_10 = arith.constant 0 : index
    %c0_11 = arith.constant 0 : index
    %c0_12 = arith.constant 0 : index
    %c0_13 = arith.constant 0 : index
    %33 = vector.load %arg4[%c0_10, %c0_11, %c0_12, %c0_13] : memref<1x3x8x128xf32, #tpu.memory_space<vmem>>, vector<1x1x8x128xf32>
    %34 = vector.shape_cast %33 : vector<1x1x8x128xf32> to vector<8x128xf32>
    %35 = arith.addf %34, %28 : vector<8x128xf32>
    %c0_14 = arith.constant 0 : index
    %c0_15 = arith.constant 0 : index
    %c0_16 = arith.constant 0 : index
    %c0_17 = arith.constant 0 : index
    %36 = vector.load %arg4[%c0_14, %c0_15, %c0_16, %c0_17] : memref<1x3x8x128xf32, #tpu.memory_space<vmem>>, vector<1x1x8x128xf32>
    %37 = vector.shape_cast %36 : vector<1x1x8x128xf32> to vector<8x128xf32>
    %38 = vector.shape_cast %35 : vector<8x128xf32> to vector<1x1x8x128xf32>
    tpu.vector_store %arg4[%c0_14, %c0_15, %c0_16, %c0_17], %38 {strides = array<i32>} : memref<1x3x8x128xf32, #tpu.memory_space<vmem>>, vector<1x1x8x128xf32>,
    %c0_18 = arith.constant 0 : index
    %c1 = arith.constant 1 : index
    %c0_19 = arith.constant 0 : index
    %c0_20 = arith.constant 0 : index
    %39 = vector.load %arg4[%c0_18, %c1, %c0_19, %c0_20] : memref<1x3x8x128xf32, #tpu.memory_space<vmem>>, vector<1x1x8x128xf32>
    %40 = vector.shape_cast %39 : vector<1x1x8x128xf32> to vector<8x128xf32>
    %41 = arith.addf %40, %30 : vector<8x128xf32>
    %c0_21 = arith.constant 0 : index
    %c1_22 = arith.constant 1 : index
    %c0_23 = arith.constant 0 : index
    %c0_24 = arith.constant 0 : index
    %42 = vector.load %arg4[%c0_21, %c1_22, %c0_23, %c0_24] : memref<1x3x8x128xf32, #tpu.memory_space<vmem>>, vector<1x1x8x128xf32>
    %43 = vector.shape_cast %42 : vector<1x1x8x128xf32> to vector<8x128xf32>
    %44 = vector.shape_cast %41 : vector<8x128xf32> to vector<1x1x8x128xf32>
    tpu.vector_store %arg4[%c0_21, %c1_22, %c0_23, %c0_24], %44 {strides = array<i32>} : memref<1x3x8x128xf32, #tpu.memory_space<vmem>>, vector<1x1x8x128xf32>,
    %c0_25 = arith.constant 0 : index
    %c2 = arith.constant 2 : index
    %c0_26 = arith.constant 0 : index
    %c0_27 = arith.constant 0 : index
    %45 = vector.load %arg4[%c0_25, %c2, %c0_26, %c0_27] : memref<1x3x8x128xf32, #tpu.memory_space<vmem>>, vector<1x1x8x128xf32>
    %46 = vector.shape_cast %45 : vector<1x1x8x128xf32> to vector<8x128xf32>
    %47 = arith.addf %46, %32 : vector<8x128xf32>
    %c0_28 = arith.constant 0 : index
    %c2_29 = arith.constant 2 : index
    %c0_30 = arith.constant 0 : index
    %c0_31 = arith.constant 0 : index
    %48 = vector.load %arg4[%c0_28, %c2_29, %c0_30, %c0_31] : memref<1x3x8x128xf32, #tpu.memory_space<vmem>>, vector<1x1x8x128xf32>
    %49 = vector.shape_cast %48 : vector<1x1x8x128xf32> to vector<8x128xf32>
    %50 = vector.shape_cast %47 : vector<8x128xf32> to vector<1x1x8x128xf32>
    tpu.vector_store %arg4[%c0_28, %c2_29, %c0_30, %c0_31], %50 {strides = array<i32>} : memref<1x3x8x128xf32, #tpu.memory_space<vmem>>, vector<1x1x8x128xf32>,
    return
  }
  func.func @transform_0(%arg0: i32, %arg1: i32) -> (i32, i32) {
    %c1_i32 = arith.constant 1 : i32
    %0 = arith.muli %arg0, %c1_i32 : i32
    %1 = arith.addi %0, %arg1 : i32
    %c0_i32 = arith.constant 0 : i32
    %2 = arith.minsi %1, %c0_i32 : i32
    %c0_i32_0 = arith.constant 0 : i32
    %c0_i32_1 = arith.constant 0 : i32
    return %2, %c0_i32_0 : i32, i32
  }
  func.func @transform_1(%arg0: i32, %arg1: i32) -> (i32, i32) {
    %c1_i32 = arith.constant 1 : i32
    %0 = arith.muli %arg0, %c1_i32 : i32
    %1 = arith.addi %0, %arg1 : i32
    %c0_i32 = arith.constant 0 : i32
    %2 = arith.minsi %1, %c0_i32 : i32
    %c0_i32_0 = arith.constant 0 : i32
    %c0_i32_1 = arith.constant 0 : i32
    return %2, %c0_i32_0 : i32, i32
  }
  func.func @transform_2(%arg0: i32, %arg1: i32) -> (i32, i32, i32, i32) {
    %c0_i32 = arith.constant 0 : i32
    %c0_i32_0 = arith.constant 0 : i32
    %c0_i32_1 = arith.constant 0 : i32
    %c0_i32_2 = arith.constant 0 : i32
    return %arg0, %c0_i32, %c0_i32_0, %c0_i32_1 : i32, i32, i32, i32
  }
}

</mosaic_0001>

<bundles_post_ra>
// kernel: tpu_custom_call.1
= control target key start
LH: loop header
LB: loop body
LE: loop exit
PB: predicated region body
PF: predicated region fallthrough
CT: control target
= control target key end

     0   :  { %7 = vsyncpa [#allocation3], 0  ;;  %s951_s0 = inlined_call_operand.hbm [shape: f32[16,128], index: 0, kind: input, shape index: {}]   ;;  %s952_s1 = inlined_call_operand.hbm [shape: f32[16,128], index: 1, kind: input, shape index: {}]   ;;  %s953_s2 = inlined_call_operand.hbm [shape: f32[2,3,8,128], index: 2, kind: output, shape index: {}]  }
   0x1   :  { %9 = vsyncpa [#allocation3 + $0x1], 0 }
   0x2   :  { %10 = vsyncpa [#allocation6], 0 }
   0x3   :  { %12 = vsyncpa [#allocation6 + $0x1], 0 }
   0x4   :  { %13 = vsyncpa [#allocation4], 0 }
   0x5   :  { %15 = vsyncpa [#allocation4 + $0x1], 0  ;;  %s768_s9 = smov 0   ;;  %s770_s10 = smov 0  }
   0x6   :  { %s772_s11 = smov 0   ;;  %s774_s12 = smov 0  }
   0x7   :  { %s776_s13 = smov 0   ;;  %s778_s14 = smov 0  }
   0x8   :  { %s780_s15 = smov 0   ;;  %s782_s16 = smov 0  }
   0x9 LB: > { %s447_s17 = sadd.s32 4294967295, %s745_s16   ;;  %s448_s18 = sadd.s32 4294967294, %s745_s16   ;;  %s745_s16 = sphi %s782_s16, %s21_s16   ;;  %s741_s15 = sphi %s780_s15, %s965_s15   ;;  %s737_s14 = sphi %s778_s14, %s964_s14   ;;  %s733_s13 = sphi %s776_s13, %s941_s13   ;;  %s729_s12 = sphi %s774_s12, %s963_s12   ;;  %s725_s11 = sphi %s772_s11, %s962_s11   ;;  %s721_s10 = sphi %s770_s10, %s961_s10   ;;  %s717_s9 = sphi %s768_s9, %s960_s9  }
   0xa   : > { %s33_s19 = sadd.s32 1, %s741_s15  ;;  %p714_p1 = scmp.ne.s32.totalorder %s733_s13, 0 }
   0xb   : > { %p35_p0 = scmp.ge.s32.totalorder %s33_s19, 2  ;;  %p54_p2 = scmp.eq.s32.totalorder %s745_s16, 0 }
   0xc   : > { %p59_p3 = scmp.ne.s32.totalorder %s733_s13, %s729_s12  ;;  %p60_p5 = scmp.eq.s32.totalorder %s447_s17, 0 }
   0xd   : > { %s967_s19 = smov (%p35_p0, %s33_s19), 0  ;;  %p814_p4 = por %p714_p1, %p54_p2 }
   0xe   : > { %p818_p6 = por %p60_p5, %p59_p3  ;;  %s101_s22 = ssub.s32 %s741_s15, %s967_s19 }
   0xf   : > { %p102_p7 = scmp.eq.s32.totalorder %s101_s22, 0  ;;  %s104_s23 = sadd.s32 1, %s725_s11 }
  0x10   : > { %p114_p8 = scmp.ne.s32.totalorder %s725_s11, %s721_s10  ;;  %p115_p9 = scmp.eq.s32.totalorder %s447_s17, 1 }
  0x11   : > { %s826_s24 = scalar_select %p102_p7, %s725_s11, %s104_s23  }
  0x12   : > { %p120_p10 = scmp.ne.s32.totalorder %s721_s10, %s717_s9  ;;  %p121_p11 = scmp.eq.s32.totalorder %s448_s18, 1 }
  0x13   : > { %p832_p12 = por %p115_p9, %p114_p8  ;;  %p450_p13 = scmp.ge.s32.totalorder %s745_s16, 2 }
  0x14   : > { %p837_p0 = por %p121_p11, %p120_p10  ;;  %p491_p1 = scmp.lt.s32.totalorder %s745_s16, 2 }
  0x15   : > { %s154_s29 = sshll.u32 %s951_s0, 4  ;;  %s747_s30 = smov [#allocation2]   ;;  %s155_s29 = int_to_ptr.hbm [resolvable:$true] %s154_s29 }
  0x16   : > { %s156_s3 = sshll.u32 %s747_s30, 4  ;;  %p847_p2 = pnand %p491_p1, %p814_p4  ;;  %s157_s3 = int_to_ptr.vmem [resolvable:$true] %s156_s3 }
  0x17   : > { %p457_p3 = scmp.ge.s32.totalorder %s745_s16, 1  ;;  %p189_p5 = scmp.lt.s32.totalorder %s745_s16, 3 }
  0x18   : > { %s578_s5 = sshra.s32 %s155_s29, 4  ;;  %p582_p8 = pneg %p847_p2  ;;  %s579_s5 = int_to_ptr.hbm [resolvable:$true] %s578_s5 }
  0x19   : > { %s580_s6 = scalar_lea.hbm %s579_s5, 16  ;;  %s585_s12 = scalar_lea.hbm %s951_s0, 16 }
  0x1a   : > { %p581_p7 = scmp.ne.s32.totalorder %s579_s5, %s580_s6  ;;  %p587_p4 = scmp.lt.s32.totalorder %s585_s12, %s580_s6 }
  0x1c   : > { %p583_p9 = pnand %p582_p8, %p581_p7 }
  0x1e   : > { %p584_p10 = pneg %p583_p9 }
  0x20   : > { %p589_p11 = pnand %p587_p4, %p584_p10 }
  0x22   : > { %592 = shalt.err (!%p589_p11)
}
  0x23   : > { %s748_s17 = smov 128   ;;  %s749_s18 = smov 8  }
  0x24   : > { %483 = dma.hbm_to_vmem [thread:$0]  (!%p847_p2), %s155_s29, 256, %s157_s3, [#allocation3], %s748_s17, %s748_s17, %s749_s18  }
  0x25   : > { %p867_p1 = pnand %p457_p3, %p189_p5  ;;  %s179_s27 = sshll.u32 %s952_s1, 4  ;;  %s180_s27 = int_to_ptr.hbm [resolvable:$true] %s179_s27 }
  0x26   : > { %s750_s28 = smov [#allocation5]   ;;  %s608_s5 = sshra.s32 %s180_s27, 4  ;;  %s609_s5 = int_to_ptr.hbm [resolvable:$true] %s608_s5 }
  0x27   : > { %s181_s30 = sshll.u32 %s750_s28, 4  ;;  %s610_s6 = scalar_lea.hbm %s609_s5, 16  ;;  %s182_s30 = int_to_ptr.vmem [resolvable:$true] %s181_s30 }
  0x28   : > { %p611_p7 = scmp.ne.s32.totalorder %s609_s5, %s610_s6  ;;  %s615_s7 = scalar_lea.hbm %s952_s1, 16 }
  0x29   : > { %p617_p3 = scmp.lt.s32.totalorder %s615_s7, %s610_s6 }
  0x2a   : > { %p613_p9 = pnand %p611_p7, %p582_p8 }
  0x2c   : > { %p614_p10 = pneg %p613_p9 }
  0x2e   : > { %p619_p5 = pnand %p617_p3, %p614_p10 }
  0x30   : > { %622 = shalt.err (!%p619_p5)
}
  0x31   : > { %486 = dma.hbm_to_vmem [thread:$0]  (!%p847_p2), %s180_s27, 256, %s182_s30, [#allocation6], %s748_s17, %s748_s17, %s749_s18  }
  0x32   : > { %193 = sbr.rel (%p867_p1) target bundleno = 97 (0x61), region = 28  ;;  %s195_s8 = sand.u32 (!%p867_p1), 1, %s733_s13  }
  0x33   : > { %s458_s12 = sshll.u32 (!%p867_p1), %s195_s8, 4  ;;  %s196_s22 = scalar_lea.sflag (!%p867_p1), [#allocation3], %s195_s8 }
  0x34   : > { %s199_s23 = scalar_lea.vmem (!%p867_p1), [#allocation2], %s458_s12 }
  0x37   : > { %703 = dma.done.wait (%p818_p6), %s196_s22, 256  }
  0x38   : > { %705 = vsyncadd (%p818_p6), %s196_s22, 4294967040  ;;  %s206_s28 = scalar_lea.sflag [#allocation6], %s195_s8  ;;  %s209_s5 = scalar_lea.vmem [#allocation5], %s458_s12 }
  0x39   : > { %707 = dma.done.wait (%p818_p6), %s206_s28, 256  }
  0x3a   : > { %709 = vsyncadd (%p818_p6), %s206_s28, 4294967040  ;;  %s462_s4 = sshll.u32 %s737_s14, 4  ;;  %v295_v0 = vlaneseq  ;;  %s233_s17 = sand.u32 1, %s721_s10   ;;  %v251_v6 = vld [vmem:[%s199_s23] sm:$0xff]  ;;  %v252_v7 = vld [vmem:[%s199_s23 + $0x8] sm:$0xff] }
  0x3b   : > { %v298_v1 = vstv %s462_s4  ;;  %s472_s18 = smul.u32 24, %s233_s17  ;;  %v291_v8 = vld [vmem:[%s209_s5] sm:$0xff]  ;;  %v460_v9 = vmul.f32 -1.442695, %v251_v6  ;;  %v461_v10 = vmul.f32 -1.442695, %v252_v7 }
  0x3c   : > { %v296_v2 = vshrl.u32 %v295_v0, 7  ;;  %v292_v11 = vld [vmem:[%s209_s5 + $0x8] sm:$0xff]  ;;  %s473_s20 = smul.u32 24, %s737_s14  ;;  %s328_s3 = scalar_lea.sflag [#allocation4], %s233_s17 }
  0x3d   : > { %570 = vpow2.f32 %v460_v9  ;;  %s899_s21 = scalar_lea.vmem [#allocation7], %s472_s18  ;;  %s658_s23 = scalar_lea.hbm %s953_s2, 48 }
  0x3e   : > { %v297_v3 = vadd.s32 8, %v296_v2  ;;  %v299_v4 = vadd.s32 %v298_v1, %v296_v2  ;;  %572 = vpow2.f32 %v461_v10  ;;  %s339_s6 = scalar_lea.hbm %s953_s2, %s473_s20  ;;  %s340_s14 = sshll.u32 %s899_s21, 4  ;;  %s341_s14 = int_to_ptr.vmem [resolvable:$true] %s340_s14 }
  0x3f   : > { %s342_s29 = sshll.u32 %s339_s6, 4  ;;  %s343_s29 = int_to_ptr.hbm [resolvable:$true] %s342_s29 }
  0x40   : > { %v300_v5 = vadd.s32 %v298_v1, %v297_v3  ;;  %vm301_vm0 = vcmp.lt.s32.totalorder %v299_v4, 16  ;;  %s652_s7 = sshra.s32 %s343_s29, 4  ;;  %s653_s7 = int_to_ptr.hbm [resolvable:$true] %s652_s7 }
  0x41   : > { %v309_v12 = vsel %vm301_vm0, %v291_v8, 0.0  ;;  %s654_s8 = scalar_lea.hbm %s653_s7, 24  ;;  %p659_p4 = scmp.lt.s32.totalorder %s653_s7, %s953_s2 }
  0x42   : > { %vm302_vm1 = vcmp.lt.s32.totalorder %v300_v5, 16  ;;  %p655_p6 = scmp.ne.s32.totalorder %s653_s7, %s654_s8  ;;  %p660_p11 = scmp.lt.s32.totalorder %s658_s23, %s654_s8 }
  0x43   : > { %v310_v13 = vsel %vm302_vm1, %v292_v11, 0.0  ;;  %v571_v15 = vpop.eup %570 }
  0x44   : > { %v315_v14 = vadd.f32 %v310_v13, %v309_v12  ;;  %v573_v16 = vpop.eup %572  ;;  %v259_v17 = vadd.f32 1.0, %v571_v15  ;;  %p656_p2 = pnand %p655_p6, %p832_p12  ;;  %p661_p1 = por %p660_p11, %p659_p4 }
  0x45   : > { %v260_v18 = vadd.f32 1.0, %v573_v16 }
  0x46   : > { %466 = vst [vmem:[%s899_s21 + $0x10] sm:$0xff] %v315_v14  ;;  %574 = vrcp.f32 %v259_v17  ;;  %vm266_vm2 = vweird.f32 %v259_v17  ;;  %v272_v22 = vand.u32 2147483648, %v259_v17  ;;  %v270_v25 = vand.u32 2147483647, %v259_v17  ;;  %p657_p8 = pneg %p656_p2 }
  0x47   : > { %576 = vrcp.f32 %v260_v18  ;;  %v287_v26 = vand.u32 2147483648, %v260_v18  ;;  %vm281_vm4 = vweird.f32 %v260_v18  ;;  %v285_v28 = vand.u32 2147483647, %v260_v18 }
  0x48   : > { %v273_v30 = vor.u32 1.1754944e-38, %v272_v22  ;;  %vm271_vm7 = vcmp.eq.f32.partialorder %v270_v25, 8.507059e+37  ;;  %p662_p7 = pnand %p661_p1, %p657_p8 }
  0x49   : > { %v288_v33 = vor.u32 1.1754944e-38, %v287_v26  ;;  %vm286_vm9 = vcmp.eq.f32.partialorder %v285_v28, 8.507059e+37 }
  0x4c   : > { %v575_v19 = vpop.eup %574 }
  0x4d   : > { %v577_v20 = vpop.eup %576  ;;  %v262_v21 = vmul.f32 %v575_v19, %v259_v17  ;;  %vm267_vm3 = vweird.f32 %v575_v19 }
  0x4e   : > { %v277_v23 = vmul.f32 %v577_v20, %v260_v18  ;;  %vm282_vm5 = vweird.f32 %v577_v20  ;;  %vm268_vm6 = vmor %vm266_vm2, %vm267_vm3 }
  0x4f   : > { %v263_v24 = vsub.f32 1.0, %v262_v21  ;;  %vm283_vm8 = vmor %vm281_vm4, %vm282_vm5 }
  0x50   : > { %v278_v27 = vsub.f32 1.0, %v277_v23 }
  0x51   : > { %v264_v29 = vmul.f32 %v575_v19, %v263_v24 }
  0x52   : > { %v279_v31 = vmul.f32 %v577_v20, %v278_v27 }
  0x53   : > { %v265_v32 = vadd.f32 %v575_v19, %v264_v29 }
  0x54   : > { %v280_v34 = vadd.f32 %v577_v20, %v279_v31 }
  0x55   : > { %v269_v35 = vsel %vm268_vm6, %v575_v19, %v265_v32 }
  0x56   : > { %v274_v36 = vsel %vm271_vm7, %v273_v30, %v269_v35  ;;  %v284_v37 = vsel %vm283_vm8, %v577_v20, %v280_v34 }
  0x57   : > { %v289_v38 = vsel %vm286_vm9, %v288_v33, %v284_v37  ;;  %v307_v39 = vsel %vm301_vm0, %v274_v36, 0.0 }
  0x58   : > { %v308_v40 = vsel %vm302_vm1, %v289_v38, 0.0  ;;  %v311_v41 = vmul.f32 %v309_v12, %v307_v39 }
  0x59   : > { %v312_v42 = vmul.f32 %v310_v13, %v308_v40  ;;  %v314_v43 = vadd.f32 %v308_v40, %v307_v39 }
  0x5b   : > { %v313_v44 = vadd.f32 %v312_v42, %v311_v41  ;;  %464 = vst [vmem:[%s899_s21 + $0x8] sm:$0xff] %v314_v43 }
  0x5d   : > { %318 = vst [vmem:[%s899_s21] sm:$0xff] %v313_v44 }
  0x5e   : > { %665 = shalt.err (!%p662_p7)
}
  0x5f   : > { %s751_s4 = smov 128   ;;  %s752_s17 = smov 8  }
  0x60   : > { %478 = dma.vmem_to_hbm [thread:$0]  (%p832_p12), %s341_s14, 384, %s343_s29, %s328_s3, %s751_s4, %s751_s4, %s752_s17  }
  0x61 PF: > { %s357_s18 = sand.u32 1, %s717_s9   ;;  %p488_p9 = pnand %p450_p13, %p837_p0 }
  0x62   : > { %s358_s21 = scalar_lea.sflag [#allocation4], %s357_s18 }
  0x63   : > { %p489_p10 = pneg %p488_p9 }
  0x65   : > { %711 = dma.done.wait (%p489_p10), %s358_s21, 384  }
  0x66   : > { %713 = vsyncadd (%p489_p10), %s358_s21, 4294966912  ;;  %s21_s16 = sadd.s32 1, %s745_s16   ;;  %s960_s9 = smov %s721_s10 }
  0x67   : > { %p18_p3 = scmp.ge.s32.totalorder %s21_s16, 4   ;;  %s961_s10 = smov %s725_s11 }
  0x68   : > { %s962_s11 = smov %s826_s24  ;;  %s963_s12 = smov %s733_s13 }
  0x69   : > { %s941_s13 = smov 0   ;;  %s964_s14 = smov %s741_s15 }
  0x6a   : > { %s965_s15 = smov %s967_s19  ;;  %20 = sbr.rel (!%p18_p3) target bundleno = 9 (0x9), region = 92 }
  0x6f   :  { %364 = vsyncpa [#allocation3], 1 }
  0x70   :  { %366 = vsyncpa [#allocation3 + $0x1], 1 }
  0x71   :  { %367 = vsyncpa [#allocation6], 1 }
  0x72   :  { %369 = vsyncpa [#allocation6 + $0x1], 1 }
  0x73   :  { %370 = vsyncpa [#allocation4], 1 }
  0x74   :  { %372 = vsyncpa [#allocation4 + $0x1], 1 }

</bundles_post_ra>
